<compile_context>
chip_gen: v7x
topology: tpu7x:2x2x1
jax: 0.10.0
libtpu: 0.0.40
codegen_flags: <defaults>
</compile_context>

<pallas_src>
import functools

import jax
import jax.numpy as jnp
from jax.experimental import pallas as pl
from jax.experimental.pallas import tpu as pltpu


# ---------------------------------------------------------------------------
# VMEM budgeting per generation.
# ---------------------------------------------------------------------------
def _vmem_limit_bytes():
    phys = None
    try:
        phys = int(pltpu.get_tpu_info().vmem_capacity_bytes)
    except Exception:
        phys = None
    if not phys or phys <= 0:
        phys = 64 * 1024 * 1024          # conservative fallback: v7x (64 MiB / TC)
    # ~25% headroom for compiler temporaries / internal scratch; cap at 96 MiB.
    return int(min((phys * 3) // 4, 96 * 1024 * 1024))


def _largest_divisor_at_most(n, cap):
    cap = int(max(1, min(cap, n)))
    for d in range(cap, 0, -1):
        if n % d == 0:
            return d
    return 1


# ---------------------------------------------------------------------------
# Excite MLP: sigmoid(relu(y @ W1.T) @ W2.T).  Weights are pre-transposed so
# both operands keep C on the lane axis; MXU for real widths, VPU for tiny C.
# ---------------------------------------------------------------------------
def _se_mlp(y, w1t_ref, w2t_ref, use_mxu):
    w1t = w1t_ref[...].astype(jnp.float32)                            # (C, Cr)
    w2t = w2t_ref[...].astype(jnp.float32)                            # (Cr, C)
    if use_mxu:
        h = jnp.dot(y, w1t, preferred_element_type=jnp.float32)       # (rows, Cr)
        h = jnp.maximum(h, 0.0)
        s = jnp.dot(h, w2t, preferred_element_type=jnp.float32)       # (rows, C)
    else:
        # Tiny-C fallback: MXU would be almost entirely padding here and the
        # (rows, C, Cr) intermediates are only a few KiB.
        h = jnp.sum(y[:, :, None] * w1t[None, :, :], axis=1)          # (rows, Cr)
        h = jnp.maximum(h, 0.0)
        s = jnp.sum(h[:, :, None] * w2t[None, :, :], axis=1)          # (rows, C)
    return jax.nn.sigmoid(s)


# ---------------------------------------------------------------------------
# Kernels
# ---------------------------------------------------------------------------
def _se_fused_kernel(x_ref, w1t_ref, w2t_ref, o_ref, *, inv_hw, use_mxu):
    # x_ref / o_ref: (TB, C, HW) stream blocks kept in the input dtype.
    x = x_ref[...]
    # Squeeze: lane-axis sum; f32 accumulation stays fused per-vreg (no full
    # f32 copy of the streamed block); 1/HW folded as a static constant.
    y = jnp.sum(x, axis=-1, dtype=jnp.float32) * inv_hw               # (TB, C)
    s = _se_mlp(y, w1t_ref, w2t_ref, use_mxu)                         # (TB, C) f32
    # Rescale: per-channel scale broadcast over spatial lanes, stream dtype.
    o_ref[...] = x * s.astype(o_ref.dtype)[:, :, None]


def _se_pool_kernel(x_ref, w1t_ref, w2t_ref, s_ref, acc_ref, *, inv_hw, use_mxu):
    # grid = (B, HW // thw); x block (1, C, thw); s block (1, 1, C) resident over h.
    h = pl.program_id(1)

    @pl.when(h == 0)
    def _():
        acc_ref[...] = jnp.zeros_like(acc_ref)

    acc_ref[...] += jnp.sum(x_ref[...], axis=-1, dtype=jnp.float32)   # (1, C)

    @pl.when(h == pl.num_programs(1) - 1)
    def _():
        y = acc_ref[...] * inv_hw                                     # (1, C)
        s = _se_mlp(y, w1t_ref, w2t_ref, use_mxu)                     # (1, C)
        s_ref[...] = s[:, None, :]                                    # (1, 1, C)


def _se_scale_kernel(x_ref, s_ref, o_ref):
    # x/o block (1, C, thw); s block (1, 1, C) f32.
    scale = jnp.transpose(s_ref[...], (0, 2, 1)).astype(o_ref.dtype)  # (1, C, 1)
    o_ref[...] = x_ref[...] * scale


# ---------------------------------------------------------------------------
# Wrappers
# ---------------------------------------------------------------------------
def _se_layer_tiled(x3, w1t, w2t, *, B, C, HW, Cr, inv_hw, use_mxu, itemsize,
                    stream_budget, vmem_limit, out_dtype):
    # Two lane-dense passes (2 reads + 1 write of x) for feature maps whose
    # single batch row does not fit the streaming VMEM budget.
    if HW % 128 != 0:
        raise ValueError(
            "SELayer Pallas kernel: one batch row needs "
            f"{4 * C * HW * itemsize} bytes of streamed blocks (> budget "
            f"{stream_budget}) and H*W={HW} is not a multiple of 128, so the "
            "spatial axis cannot be tiled lane-densely. Reduce the spatial "
            "size or pad H*W to a multiple of 128.")
    cap_k = stream_budget // (4 * C * 128 * itemsize)
    if cap_k < 1:
        raise ValueError(
            "SELayer Pallas kernel: even a 128-wide spatial tile "
            f"({4 * C * 128 * itemsize} bytes) exceeds the VMEM stream budget "
            f"({stream_budget} bytes).")
    k = _largest_divisor_at_most(HW // 128, cap_k)
    thw = 128 * k
    nh = HW // thw

    # Pass 1: pool over HW ("arbitrary" reduction axis) + excite MLP fused on
    # the last spatial tile; emits per-(batch, channel) scales in f32.
    scales = pl.pallas_call(
        functools.partial(_se_pool_kernel, inv_hw=inv_hw, use_mxu=use_mxu),
        out_shape=jax.ShapeDtypeStruct((B, 1, C), jnp.float32),
        grid=(B, nh),
        in_specs=[
            pl.BlockSpec((1, C, thw), lambda b, h: (b, 0, h)),
            pl.BlockSpec((C, Cr), lambda b, h: (0, 0)),   # resident weights
            pl.BlockSpec((Cr, C), lambda b, h: (0, 0)),
        ],
        out_specs=pl.BlockSpec((1, 1, C), lambda b, h: (b, 0, 0)),
        scratch_shapes=[pltpu.VMEM((1, C), jnp.float32)],
        compiler_params=pltpu.CompilerParams(
            dimension_semantics=("parallel", "arbitrary"),
            vmem_limit_bytes=vmem_limit,
        ),
    )(x3, w1t, w2t)

    # Pass 2: rescale.  Fully "parallel" (B, HW-tile) grid so both v7x
    # TensorCores stream even when B is small.
    out3 = pl.pallas_call(
        _se_scale_kernel,
        out_shape=jax.ShapeDtypeStruct((B, C, HW), out_dtype),
        grid=(B, nh),
        in_specs=[
            pl.BlockSpec((1, C, thw), lambda b, h: (b, 0, h)),
            pl.BlockSpec((1, 1, C), lambda b, h: (b, 0, 0)),
        ],
        out_specs=pl.BlockSpec((1, C, thw), lambda b, h: (b, 0, h)),
        compiler_params=pltpu.CompilerParams(
            dimension_semantics=("parallel", "parallel"),
            vmem_limit_bytes=vmem_limit,
        ),
    )(x3, scales)
    return out3


def se_layer(x, w1, w2, *, stream_budget_bytes=None):
    """SELayer(version=1, x2=None) forward.

    x:  (B, C, H, W)
    w1: (Cr, C)  -- nn.Linear(channel, channel // reduction, bias=False).weight
    w2: (C, Cr)  -- nn.Linear(channel // reduction, channel, bias=False).weight
    """
    B, C, H, W = x.shape
    Cr = w1.shape[0]
    assert w1.shape == (Cr, C) and w2.shape == (C, Cr)
    HW = H * W
    inv_hw = float(1.0 / HW)

    vmem_limit = _vmem_limit_bytes()
    if stream_budget_bytes is None:
        # Half of the scoped limit for streamed x in/out blocks; the rest
        # covers resident weights, scratch and compiler temporaries.
        stream_budget_bytes = vmem_limit // 2

    # Pre-transpose weights so the in-kernel MLP is two plain MXU matmuls with
    # C on the lane axis for both operands.
    w1t = jnp.transpose(w1)                          # (C, Cr)
    w2t = jnp.transpose(w2)                          # (Cr, C)
    use_mxu = (C >= 128) and (Cr >= 8)

    x3 = x.reshape(B, C, HW)                         # free: no transpose
    itemsize = jnp.dtype(x.dtype).itemsize

    # VMEM accounting per streamed batch row: in + out blocks (double-buffered)
    # plus the small f32 pooled row / VPU-path MLP intermediates.
    per_row = 4 * C * HW * itemsize + 8 * C * 4
    if not use_mxu:
        per_row += 2 * Cr * C * 4
    weights_bytes = 2 * 2 * C * Cr * jnp.dtype(w1.dtype).itemsize     # double-buffered
    stream_eff = max(int(stream_budget_bytes) - weights_bytes, 4096)

    if per_row > stream_eff:
        out3 = _se_layer_tiled(
            x3, w1t, w2t, B=B, C=C, HW=HW, Cr=Cr, inv_hw=inv_hw,
            use_mxu=use_mxu, itemsize=itemsize, stream_budget=stream_eff,
            vmem_limit=vmem_limit, out_dtype=x.dtype)
        return out3.reshape(B, C, H, W)

    # ---- fused single-pass path: one read + one write of x ----
    tb = max(1, stream_eff // per_row)
    tb = min(tb, B)
    # Prefer >= 4 grid steps when B allows: amortizes the DMA prologue/epilogue
    # and lets dimension_semantics=("parallel",) shard batches over both v7x TCs.
    if B >= 4:
        tb = min(tb, B // 4)
    elif B >= 2:
        tb = min(tb, B // 2)
    tb = _largest_divisor_at_most(B, tb)
    # TODO(synk): B == 1 with a small feature map still runs as a single grid
    # step on one TensorCore; the tiled path above covers the large-map case.

    kernel = functools.partial(_se_fused_kernel, inv_hw=inv_hw, use_mxu=use_mxu)
    out3 = pl.pallas_call(
        kernel,
        out_shape=jax.ShapeDtypeStruct((B, C, HW), x.dtype),
        grid=(B // tb,),
        in_specs=[
            pl.BlockSpec((tb, C, HW), lambda b: (b, 0, 0)),
            pl.BlockSpec((C, Cr), lambda b: (0, 0)),       # resident weights
            pl.BlockSpec((Cr, C), lambda b: (0, 0)),
        ],
        out_specs=pl.BlockSpec((tb, C, HW), lambda b: (b, 0, 0)),
        compiler_params=pltpu.CompilerParams(
            dimension_semantics=("parallel",),
            vmem_limit_bytes=vmem_limit,
        ),
    )(x3, w1t, w2t)
    return out3.reshape(B, C, H, W)


# ---------------------------------------------------------------------------
# Reference + tests
# ---------------------------------------------------------------------------
def se_layer_ref(x, w1, w2):
    """Pure-JAX reference mirroring the PyTorch forward."""
    y = jnp.mean(x, axis=(2, 3))                  # (B, C)
    h = jnp.maximum(y @ w1.T, 0.0)                # (B, Cr)
    s = jax.nn.sigmoid(h @ w2.T)                  # (B, C)
    return x * s[:, :, None, None]


def _make_case(key, B, C, H, W, reduction):
    Cr = C // reduction
    kx, k1, k2 = jax.random.split(key, 3)
    x = jax.random.normal(kx, (B, C, H, W), dtype=jnp.float32)
    # nn.Linear weight layout (out_features, in_features).
    w1 = jax.random.uniform(k1, (Cr, C), jnp.float32, -1.0, 1.0) / jnp.sqrt(C)
    w2 = jax.random.uniform(k2, (C, Cr), jnp.float32, -1.0, 1.0) / jnp.sqrt(Cr)
    return x, w1, w2


def _check(out, ref, atol, rtol, name):
    assert out.shape == ref.shape, name
    assert jnp.allclose(out, ref, atol=atol, rtol=rtol), f"mismatch vs reference ({name})"


if __name__ == "__main__":
    key = jax.random.PRNGKey(0)
    k1, k2, k3, k4 = jax.random.split(key, 4)

    # Case 1: SELayer(channel=32, reduction=16); tiny C -> VPU excite-MLP path.
    x, w1, w2 = _make_case(k1, B=2, C=32, H=16, W=16, reduction=16)
    out = jax.block_until_ready(se_layer(x, w1, w2))
    _check(out, se_layer_ref(x, w1, w2), 1e-5, 1e-5, "case1 fused VPU")

    # Case 2: batch tiling with TB > 1 (B=8 -> tb=2, grid=(4,)).
    x, w1, w2 = _make_case(k2, B=8, C=16, H=16, W=16, reduction=8)
    out = jax.block_until_ready(se_layer(x, w1, w2))
    _check(out, se_layer_ref(x, w1, w2), 1e-5, 1e-5, "case2 fused tb>1")

    # Case 3: C=128, Cr=8 -> MXU excite-MLP path (looser tol: MXU bf16 passes).
    x, w1, w2 = _make_case(k3, B=4, C=128, H=8, W=16, reduction=16)
    out = jax.block_until_ready(se_layer(x, w1, w2))
    _check(out, se_layer_ref(x, w1, w2), 1e-2, 1e-2, "case3 fused MXU")

    # Case 4: tiny stream budget forces the two-pass HW-tiled fallback
    # (pool+MLP with thw=128 / nh=2, then the fully-parallel rescale pass).
    x, w1, w2 = _make_case(k4, B=2, C=16, H=16, W=16, reduction=8)
    out = jax.block_until_ready(se_layer(x, w1, w2, stream_budget_bytes=40_000))
    _check(out, se_layer_ref(x, w1, w2), 1e-5, 1e-5, "case4 tiled fallback")

    print("KERNEL_OK")
</pallas_src>

<mosaic_0001>
module attributes {stable_mosaic.version = 11 : i64} {
  func.func @_se_fused_kernel(%arg0: i32, %arg1: memref<1x32x256xf32, #tpu.memory_space<vmem>>, %arg2: memref<32x2xf32, #tpu.memory_space<vmem>>, %arg3: memref<2x32xf32, #tpu.memory_space<vmem>>, %arg4: memref<1x32x256xf32, #tpu.memory_space<vmem>>) attributes {dimension_semantics = [#tpu.dimension_semantics<parallel>], iteration_bounds = array<i64: 2>, scalar_prefetch = 0 : i64, scratch_operands = 0 : i64, tpu.core_type = #tpu.core_type<tc>, window_params = [{transform_indices = @transform_0, window_bounds = array<i64: 1, 32, 256>}, {pipeline_mode = #tpu.pipeline_mode<synchronous>, transform_indices = @transform_1, window_bounds = array<i64: 32, 2>}, {pipeline_mode = #tpu.pipeline_mode<synchronous>, transform_indices = @transform_2, window_bounds = array<i64: 2, 32>}, {transform_indices = @transform_3, window_bounds = array<i64: 1, 32, 256>}]} {
    %c0 = arith.constant 0 : index
    %c0_0 = arith.constant 0 : index
    %c0_1 = arith.constant 0 : index
    %0 = vector.load %arg1[%c0, %c0_0, %c0_1] : memref<1x32x256xf32, #tpu.memory_space<vmem>>, vector<1x32x256xf32>
    %cst = arith.constant dense<0.000000e+00> : vector<1x32xf32>
    %1 = vector.multi_reduction <add>, %0, %cst [2] : vector<1x32x256xf32> to vector<1x32xf32>
    %cst_2 = arith.constant 3.906250e-03 : f32
    %2 = vector.broadcast %cst_2 : f32 to vector<1x32xf32>
    %3 = arith.mulf %1, %2 : vector<1x32xf32>
    %c0_3 = arith.constant 0 : index
    %c0_4 = arith.constant 0 : index
    %4 = vector.load %arg2[%c0_3, %c0_4] : memref<32x2xf32, #tpu.memory_space<vmem>>, vector<32x2xf32>
    %c0_5 = arith.constant 0 : index
    %c0_6 = arith.constant 0 : index
    %5 = vector.load %arg3[%c0_5, %c0_6] : memref<2x32xf32, #tpu.memory_space<vmem>>, vector<2x32xf32>
    %6 = vector.shape_cast %3 : vector<1x32xf32> to vector<1x32x1xf32>
    %7 = vector.shape_cast %4 : vector<32x2xf32> to vector<1x32x2xf32>
    %8 = vector.broadcast %6 : vector<1x32x1xf32> to vector<1x32x2xf32>
    %9 = arith.mulf %8, %7 : vector<1x32x2xf32>
    %cst_7 = arith.constant dense<0.000000e+00> : vector<1x2xf32>
    %10 = vector.multi_reduction <add>, %9, %cst_7 [1] : vector<1x32x2xf32> to vector<1x2xf32>
    %cst_8 = arith.constant 0.000000e+00 : f32
    %11 = vector.broadcast %cst_8 : f32 to vector<1x2xf32>
    %12 = arith.maximumf %10, %11 : vector<1x2xf32>
    %13 = vector.shape_cast %12 : vector<1x2xf32> to vector<1x2x1xf32>
    %14 = vector.shape_cast %5 : vector<2x32xf32> to vector<1x2x32xf32>
    %15 = vector.broadcast %13 : vector<1x2x1xf32> to vector<1x2x32xf32>
    %16 = arith.mulf %15, %14 : vector<1x2x32xf32>
    %cst_9 = arith.constant dense<0.000000e+00> : vector<1x32xf32>
    %17 = vector.multi_reduction <add>, %16, %cst_9 [1] : vector<1x2x32xf32> to vector<1x32xf32>
    %18 = arith.negf %17 : vector<1x32xf32>
    %19 = math.exp %18 : vector<1x32xf32>
    %cst_10 = arith.constant 1.000000e+00 : f32
    %20 = vector.broadcast %cst_10 : f32 to vector<1x32xf32>
    %21 = arith.addf %20, %19 : vector<1x32xf32>
    %22 = arith.divf %20, %21 : vector<1x32xf32>
    %23 = vector.shape_cast %22 : vector<1x32xf32> to vector<1x32x1xf32>
    %24 = vector.broadcast %23 : vector<1x32x1xf32> to vector<1x32x256xf32>
    %25 = arith.mulf %0, %24 : vector<1x32x256xf32>
    %c0_11 = arith.constant 0 : index
    %c0_12 = arith.constant 0 : index
    %c0_13 = arith.constant 0 : index
    %26 = vector.load %arg4[%c0_11, %c0_12, %c0_13] : memref<1x32x256xf32, #tpu.memory_space<vmem>>, vector<1x32x256xf32>
    tpu.vector_store %arg4[%c0_11, %c0_12, %c0_13], %25 {strides = array<i32>} : memref<1x32x256xf32, #tpu.memory_space<vmem>>, vector<1x32x256xf32>,
    return
  }
  func.func @transform_0(%arg0: i32) -> (i32, i32, i32) {
    %c0_i32 = arith.constant 0 : i32
    %c0_i32_0 = arith.constant 0 : i32
    %c0_i32_1 = arith.constant 0 : i32
    return %arg0, %c0_i32, %c0_i32_0 : i32, i32, i32
  }
  func.func @transform_1(%arg0: i32) -> (i32, i32) {
    %c0_i32 = arith.constant 0 : i32
    %c0_i32_0 = arith.constant 0 : i32
    %c0_i32_1 = arith.constant 0 : i32
    return %c0_i32, %c0_i32_0 : i32, i32
  }
  func.func @transform_2(%arg0: i32) -> (i32, i32) {
    %c0_i32 = arith.constant 0 : i32
    %c0_i32_0 = arith.constant 0 : i32
    %c0_i32_1 = arith.constant 0 : i32
    return %c0_i32, %c0_i32_0 : i32, i32
  }
  func.func @transform_3(%arg0: i32) -> (i32, i32, i32) {
    %c0_i32 = arith.constant 0 : i32
    %c0_i32_0 = arith.constant 0 : i32
    %c0_i32_1 = arith.constant 0 : i32
    return %arg0, %c0_i32, %c0_i32_0 : i32, i32, i32
  }
}

</mosaic_0001>

<bundles_post_ra>
// kernel: tpu_custom_call.1
= control target key start
LH: loop header
LB: loop body
LE: loop exit
PB: predicated region body
PF: predicated region fallthrough
CT: control target
= control target key end

     0   :  { %8 = vsyncpa [#allocation3], 0  ;;  %s781_s0 = inlined_call_operand.hbm [shape: f32[2,32,256], index: 0, kind: input, shape index: {}]   ;;  %s782_s1 = inlined_call_operand.vmem [shape: f32[32,2], index: 1, kind: input, shape index: {}]   ;;  %s783_s2 = inlined_call_operand.vmem [shape: f32[2,32], index: 2, kind: input, shape index: {}]   ;;  %s784_s3 = inlined_call_operand.hbm [shape: f32[2,32,256], index: 3, kind: output, shape index: {}]  }
   0x1   :  { %10 = vsyncpa [#allocation3 + $0x1], 0 }
   0x2   :  { %11 = vsyncpa [#allocation4], 0 }
   0x3   :  { %13 = vsyncpa [#allocation4 + $0x1], 0  ;;  %s568_s12 = smov 0   ;;  %s570_s13 = smov 0  }
   0x4   :  { %s572_s14 = smov 0   ;;  %s574_s15 = smov 0  }
   0x5 LB: > { %s589_s16 = sadd.s32 4294967295, %s540_s15   ;;  %s373_s17 = sadd.s32 4294967294, %s540_s15   ;;  %s540_s15 = sphi %s574_s15, %s797_s15   ;;  %s536_s14 = sphi %s572_s14, %s796_s14   ;;  %s532_s13 = sphi %s570_s13, %s795_s13   ;;  %s528_s12 = sphi %s568_s12, %s794_s12  }
   0x6   : > { %s593_s18 = sadd.s32 1, %s540_s15   ;;  %s26_s19 = sadd.s32 1, %s536_s14 }
   0x7   : > { %s23_s20 = ssub.s32 %s540_s15, %s593_s18  ;;  %p33_p0 = scmp.ne.s32.totalorder %s536_s14, %s532_s13 }
   0x8   : > { %p24_p1 = scmp.eq.s32.totalorder %s23_s20, 0  ;;  %p34_p2 = scmp.eq.s32.totalorder %s540_s15, 0 }
   0x9   : > { %p39_p3 = scmp.ne.s32.totalorder %s532_s13, %s528_s12  ;;  %p40_p4 = scmp.eq.s32.totalorder %s589_s16, 0 }
   0xa   : > { %s605_s21 = scalar_select %p24_p1, %s536_s14, %s26_s19  }
   0xb   : > { %p607_p5 = por %p34_p2, %p33_p0  ;;  %p611_p6 = por %p40_p4, %p39_p3 }
   0xc   : > { %p105_p7 = scmp.eq.s32.totalorder %s589_s16, 1  ;;  %p111_p8 = scmp.eq.s32.totalorder %s373_s17, 1 }
   0xd   : > { %p402_p10 = scmp.lt.s32.totalorder %s540_s15, 2  ;;  %s137_s26 = sand.u32 1, %s536_s14  }
   0xe   : > { %p618_p11 = por %p105_p7, %p33_p0  ;;  %p622_p12 = por %p111_p8, %p39_p3 }
   0xf   : > { %s388_s27 = sshll.u32 %s540_s15, 10  ;;  %s376_s28 = sshll.u32 %s137_s26, 6 }
  0x10   : > { %s788_s24 = scalar_select %p618_p11, 1, 0 }
  0x11   : > { %s789_s25 = scalar_select %p622_p12, 1, 0 }
  0x12   : > { %s631_s4 = scalar_lea.hbm %s781_s0, %s388_s27  ;;  %s141_s5 = scalar_lea.vmem [#allocation2], %s376_s28 }
  0x13   : > { %s148_s6 = sshll.u32 %s141_s5, 4  ;;  %p635_p13 = pnand %p402_p10, %p607_p5  ;;  %s639_s6 = int_to_ptr.vmem [resolvable:$true] %s148_s6 }
  0x14   : > { %s641_s8 = scalar_lea.sflag [#allocation3], %s137_s26  ;;  %s444_s9 = scalar_lea.hbm %s631_s4, 1024 }
  0x15   : > { %p445_p0 = scmp.ne.s32.totalorder %s631_s4, %s444_s9  ;;  %p446_p1 = pneg %p635_p13 }
  0x16   : > { %s449_s17 = scalar_lea.hbm %s781_s0, 2048  ;;  %p450_p4 = scmp.lt.u32.totalorder %s631_s4, %s781_s0 }
  0x17   : > { %p447_p2 = pnand %p446_p1, %p445_p0  ;;  %p451_p5 = scmp.lt.u32.totalorder %s449_s17, %s444_s9 }
  0x18   : > { %p453_p8 = scmp.lt.u32.totalorder %s444_s9, %s631_s4 }
  0x19   : > { %p448_p3 = pneg %p447_p2  ;;  %p452_p7 = por %p451_p5, %p450_p4 }
  0x1b   : > { %p454_p10 = por %p453_p8, %p452_p7 }
  0x1d   : > { %p455_p9 = pnand %p454_p10, %p448_p3 }
  0x1f   : > { %458 = shalt.err (!%p455_p9)
}
  0x20   : > { %s459_s22 = scalar_lea.vmem %s639_s6, 1024  ;;  %s542_s26 = smov [#allocation2]  }
  0x21   : > { %p460_p0 = scmp.ne.s32.totalorder %s639_s6, %s459_s22  ;;  %s464_s27 = sshll.u32 %s542_s26, 4  ;;  %s465_s27 = int_to_ptr.vmem [resolvable:$false] %s464_s27 }
  0x22   : > { %s466_s28 = scalar_lea.vmem %s465_s27, 2048  ;;  %p467_p11 = scmp.lt.s32.totalorder %s639_s6, %s465_s27 }
  0x23   : > { %p462_p2 = pnand %p460_p0, %p446_p1  ;;  %p468_p4 = scmp.lt.s32.totalorder %s466_s28, %s459_s22 }
  0x25   : > { %p463_p12 = pneg %p462_p2  ;;  %p469_p5 = por %p468_p4, %p467_p11 }
  0x27   : > { %p470_p7 = pnand %p469_p5, %p463_p12 }
  0x29   : > { %473 = shalt.err (!%p470_p7)
}
  0x2a   : > { %s543_s29 = smov 256   ;;  %s544_s30 = smov 16  }
  0x2b   : > { %397 = dma.hbm_to_vmem [thread:$0]  (!%p635_p13), %s631_s4, 1024, %s639_s6, %s641_s8, %s543_s29, %s543_s29, %s544_s30  }
  0x2c   : > { %p379_p9 = scmp.ge.s32.totalorder %s540_s15, 1  ;;  %p156_p1 = scmp.lt.s32.totalorder %s540_s15, 3 }
  0x2e   : > { %p157_p3 = pnand %p379_p9, %p156_p1 }
  0x2f   : > { %s672_s5 = sand.u32 (!%p157_p3), 1, %s532_s13  }
  0x30   : > { %160 = sbr.rel (%p157_p3) target bundleno = 526 (0x20e), region = 32  ;;  %s380_s9 = sshll.u32 (!%p157_p3), %s672_s5, 6 }
  0x31   : > { %s163_s10 = scalar_lea.sflag (!%p157_p3), [#allocation3], %s672_s5  ;;  %s166_s11 = scalar_lea.vmem (!%p157_p3), [#allocation2], %s380_s9 }
  0x37   : > { %519 = dma.done.wait (%p611_p6), %s163_s10, 1024  }
  0x38   : > { %521 = vsyncadd (%p611_p6), %s163_s10, 4294966272  ;;  %v682_v0 = vld [vmem:[%s166_s11] sm:$0xff]  ;;  %v684_v1 = vld [vmem:[%s166_s11 + $0x8] sm:$0xff]  ;;  %vm222_vm0 = vcmask 15360   ;;  %vm241_vm1 = vcmask 254976   ;;  %s188_s27 = scalar_lea.vmem [#allocation5], %s380_s9 }
  0x39   : > { %v686_v2 = vld [vmem:[%s166_s11 + $0x20] sm:$0xff]  ;;  %v197_v3 = vadd.f32 %v684_v1, %v682_v0  ;;  %v690_v4 = vld [vmem:[%s166_s11 + $0x28] sm:$0xff]  ;;  %v692_v5 = vld [vmem:[%s166_s11 + $0x10] sm:$0xff]  ;;  %s300_s28 = sshll.u32 %s188_s27, 4  ;;  %s389_s29 = sshll.u32 %s589_s16, 10  ;;  %s730_s28 = int_to_ptr.vmem [resolvable:$true] %s300_s28 }
  0x3a   : > { %v694_v6 = vld [vmem:[%s166_s11 + $0x18] sm:$0xff]  ;;  %v203_v7 = vadd.f32 %v690_v4, %v686_v2  ;;  %v698_v8 = vld [vmem:[%s166_s11 + $0x30] sm:$0xff]  ;;  %v213_v15 = vld [vmem:[%s782_s1] sm:$0xff]  ;;  %s735_s10 = scalar_lea.hbm %s784_s3, %s389_s29  ;;  %s287_s16 = scalar_lea.sflag [#allocation4], %s672_s5 }
  0x3b   : > { %v700_v9 = vld [vmem:[%s166_s11 + $0x38] sm:$0xff]  ;;  %198 = vadd.xlane.f32.xlu0 %v197_v3  ;;  %v200_v10 = vadd.f32 %v694_v6, %v692_v5  ;;  %v215_v17 = vld [vmem:[%s782_s1 + $0x10] sm:$0xff]  ;;  %v214_v18 = vld [vmem:[%s782_s1 + $0x8] sm:$0xff]  ;;  %s474_s11 = scalar_lea.vmem %s730_s28, 1024  ;;  %p791_p11 = scmp.ne.s32.totalorder %s788_s24, 0 }
  0x3c   : > { %204 = vadd.xlane.f32.xlu1 %v203_v7  ;;  %v206_v11 = vadd.f32 %v700_v9, %v698_v8  ;;  %v216_v22 = vld [vmem:[%s782_s1 + $0x18] sm:$0xff]  ;;  %v217_v42 = vld [vmem:[%s783_s2] sm:$0x3]  ;;  %p475_p6 = scmp.ne.s32.totalorder %s730_s28, %s474_s11  ;;  %s545_s23 = smov [#allocation5]  }
  0x3d   : > { %s478_s4 = sshll.u32 %s545_s23, 4  ;;  %s479_s4 = int_to_ptr.vmem [resolvable:$false] %s478_s4 }
  0x3e   : > { %p476_p12 = pnand %p475_p6, %p791_p11  ;;  %s480_s6 = scalar_lea.vmem %s479_s4, 2048 }
  0x3f   : > { %201 = vadd.xlane.f32.xlu0 %v200_v10  ;;  %p481_p8 = scmp.lt.s32.totalorder %s730_s28, %s479_s4  ;;  %p482_p10 = scmp.lt.s32.totalorder %s480_s6, %s474_s11 }
  0x40   : > { %207 = vadd.xlane.f32.xlu1 %v206_v11  ;;  %p477_p13 = pneg %p476_p12 }
  0x41   : > { %p483_p0 = por %p482_p10, %p481_p8 }
  0x43   : > { %p484_p2 = pnand %p483_p0, %p477_p13 }
  0xc8   : > { %v199_v12 = vpop.xlane.xlu0 %198 }
  0xc9   : > { %v209_v13 = vmul.f32 0.00390625, %v199_v12  ;;  %v205_v14 = vpop.xlane.xlu1 %204 }
  0xca   : > { %v211_v16 = vmul.f32 0.00390625, %v205_v14 }
  0xcb   : > { %v218_v20 = vmul.f32 %v213_v15, %v209_v13 }
  0xcc   : > { %v202_v19 = vpop.xlane.xlu0 %201  ;;  %v220_v25 = vmul.f32 %v215_v17, %v211_v16 }
  0xcd   : > { %v210_v21 = vmul.f32 0.00390625, %v202_v19  ;;  %v208_v23 = vpop.xlane.xlu1 %207  ;;  %v223_v28 = vsel %vm222_vm0, %v218_v20, 0.0 }
  0xce   : > { %v212_v24 = vmul.f32 0.00390625, %v208_v23  ;;  %v226_v31 = vsel %vm222_vm0, %v220_v25, 0.0 }
  0xcf   : > { %v219_v26 = vmul.f32 %v214_v18, %v210_v21 }
  0xd0   : > { %v221_v27 = vmul.f32 %v216_v22, %v212_v24 }
  0xd1   : > { %v224_v29 = vsel %vm222_vm0, %v219_v26, 0.0 }
  0xd2   : > { %v225_v30 = vadd.f32 %v224_v29, %v223_v28  ;;  %v228_v32 = vsel %vm222_vm0, %v221_v27, 0.0 }
  0xd4   : > { %v227_v33 = vadd.f32 %v226_v31, %v225_v30 }
  0xd6   : > { %v229_v34 = vadd.f32 %v228_v32, %v227_v33 }
  0xd8   : > { %v230_v35 = vrot.slane %v229_v34, 4 }
  0xda   : > { %v231_v36 = vadd.f32 %v230_v35, %v229_v34 }
  0xdc   : > { %v232_v37 = vrot.slane %v231_v36, 2 }
  0xde   : > { %v233_v38 = vadd.f32 %v232_v37, %v231_v36 }
  0xe0   : > { %v234_v39 = vrot.slane %v233_v38, 1 }
  0xe2   : > { %v235_v40 = vadd.f32 %v234_v39, %v233_v38 }
  0xe4   : > { %v236_v41 = vmax.f32 %v235_v40, 0.0 }
  0xe6   : > { %238 = vbcast.lane.b32.xlu0 %v236_v41, 256 }
 0x158   : > { %v239_v43 = vpop.permute.xlu0 %238 }
 0x159   : > { %v240_v44 = vmul.f32 %v239_v43, %v217_v42 }
 0x15b   : > { %v242_v45 = vsel %vm241_vm1, %v240_v44, 0.0 }
 0x15c   : > { %v243_v46 = vrot.slane %v242_v45, 4 }
 0x15e   : > { %v244_v47 = vadd.f32 %v243_v46, %v242_v45 }
 0x160   : > { %v245_v48 = vrot.slane %v244_v47, 2 }
 0x162   : > { %v246_v49 = vadd.f32 %v245_v48, %v244_v47 }
 0x164   : > { %v247_v50 = vrot.slane %v246_v49, 1 }
 0x166   : > { %v248_v51 = vadd.f32 %v247_v50, %v246_v49 }
 0x168   : > { %v382_v52 = vmul.f32 -1.442695, %v248_v51 }
 0x16a   : > { %440 = vpow2.f32 %v382_v52 }
 0x174   : > { %v441_v53 = vpop.eup %440 }
 0x175   : > { %v252_v54 = vadd.f32 1.0, %v441_v53 }
 0x177   : > { %442 = vrcp.f32 %v252_v54 }
 0x181   : > { %v443_v55 = vpop.eup %442 }
 0x182   : > { %268 = vbcast.lane.b32.xlu0 %v443_v55, 280  ;;  %256 = vbcast.lane.b32.xlu1 %v443_v55, 256 }
 0x186   : > { %260 = vbcast.lane.b32.xlu1 %v443_v55, 264 }
 0x18a   : > { %264 = vbcast.lane.b32.xlu1 %v443_v55, 272 }
 0x1f4   : > { %v269_v56 = vpop.permute.xlu0 %268  ;;  %v257_v57 = vpop.permute.xlu1 %256 }
 0x1f5   : > { %v276_v58 = vmul.f32 %v269_v56, %v698_v8  ;;  %v277_v59 = vmul.f32 %v269_v56, %v700_v9  ;;  %v270_v60 = vmul.f32 %v257_v57, %v682_v0  ;;  %v271_v61 = vmul.f32 %v257_v57, %v684_v1 }
 0x1f7   : > { %284 = vst [vmem:[%s188_s27 + $0x30] sm:$0xff] %v276_v58  ;;  %285 = vst [vmem:[%s188_s27 + $0x38] sm:$0xff] %v277_v59 }
 0x1f8   : > { %278 = vst [vmem:[%s188_s27] sm:$0xff] %v270_v60  ;;  %279 = vst [vmem:[%s188_s27 + $0x8] sm:$0xff] %v271_v61  ;;  %v261_v62 = vpop.permute.xlu1 %260 }
 0x1f9   : > { %v272_v63 = vmul.f32 %v261_v62, %v692_v5  ;;  %v273_v3 = vmul.f32 %v261_v62, %v694_v6 }
 0x1fb   : > { %280 = vst [vmem:[%s188_s27 + $0x10] sm:$0xff] %v272_v63  ;;  %281 = vst [vmem:[%s188_s27 + $0x18] sm:$0xff] %v273_v3 }
 0x1fc   : > { %v265_v0 = vpop.permute.xlu1 %264 }
 0x1fd   : > { %v274_v1 = vmul.f32 %v265_v0, %v686_v2  ;;  %v275_v5 = vmul.f32 %v265_v0, %v690_v4 }
 0x1ff   : > { %282 = vst [vmem:[%s188_s27 + $0x20] sm:$0xff] %v274_v1  ;;  %283 = vst [vmem:[%s188_s27 + $0x28] sm:$0xff] %v275_v5 }
 0x200   : > { %487 = shalt.err (!%p484_p2)
}
 0x201   : > { %s488_s7 = scalar_lea.hbm %s735_s10, 1024  ;;  %s492_s19 = scalar_lea.hbm %s784_s3, 2048 }
 0x202   : > { %p489_p4 = scmp.ne.s32.totalorder %s735_s10, %s488_s7  ;;  %p493_p9 = scmp.lt.u32.totalorder %s735_s10, %s784_s3 }
 0x203   : > { %p494_p1 = scmp.lt.u32.totalorder %s492_s19, %s488_s7  ;;  %p496_p6 = scmp.lt.u32.totalorder %s488_s7, %s735_s10 }
 0x204   : > { %p490_p5 = pnand %p489_p4, %p791_p11 }
 0x205   : > { %p495_p3 = por %p494_p1, %p493_p9 }
 0x206   : > { %p491_p7 = pneg %p490_p5 }
 0x207   : > { %p497_p12 = por %p496_p6, %p495_p3 }
 0x209   : > { %p498_p13 = pnand %p497_p12, %p491_p7 }
 0x20b   : > { %501 = shalt.err (!%p498_p13)
}
 0x20c   : > { %s546_s26 = smov 256   ;;  %s547_s27 = smov 16  }
 0x20d   : > { %392 = dma.vmem_to_hbm [thread:$0]  (%p791_p11), %s730_s28, 1024, %s735_s10, %s287_s16, %s546_s26, %s546_s26, %s547_s27  }
 0x20e PF: > { %s315_s29 = sand.u32 1, %s528_s12   ;;  %p792_p8 = scmp.ne.s32.totalorder %s789_s25, 0 }
 0x20f   : > { %p793_p10 = scmp.ge.s32.totalorder %s540_s15, 2  ;;  %s316_s30 = scalar_lea.sflag [#allocation4], %s315_s29 }
 0x211   : > { %p399_p0 = pnand %p793_p10, %p792_p8 }
 0x213   : > { %523 = dma.done.wait (!%p399_p0), %s316_s30, 1024  }
 0x214   : > { %525 = vsyncadd (!%p399_p0), %s316_s30, 4294966272  ;;  %p16_p2 = scmp.ge.s32.totalorder %s593_s18, 4   ;;  %s794_s12 = smov %s532_s13 }
 0x215   : > { %s795_s13 = smov %s536_s14  ;;  %s796_s14 = smov %s605_s21 }
 0x216   : > { %s797_s15 = smov %s593_s18  ;;  %18 = sbr.rel (!%p16_p2) target bundleno = 5 (0x5), region = 77 }
 0x21d   :  { %321 = vsyncpa [#allocation3], 1 }
 0x21e   :  { %323 = vsyncpa [#allocation3 + $0x1], 1 }
 0x21f   :  { %324 = vsyncpa [#allocation4], 1 }
 0x220   :  { %326 = vsyncpa [#allocation4 + $0x1], 1 }

</bundles_post_ra>
